<compile_context>
chip_gen: v6e
topology: v6e:2x2x1
jax: 0.10.0
libtpu: 0.0.40
codegen_flags: <defaults>
</compile_context>

<pallas_src>
import functools

import jax
import jax.numpy as jnp
from jax.experimental import pallas as pl
from jax.experimental.pallas import tpu as pltpu

BN_EPS = 1e-5        # nn.BatchNorm default eps
NORM_EPS = 1e-12     # F.normalize default eps
TEMPERATURE = 0.5    # ContrastiveLoss temperature
_VMEM_LIMIT = 32 * 1024 * 1024


def _round_up(x, m):
    return -(-x // m) * m


def _pick_tile(dim, choices):
    for c in choices:
        if dim % c == 0:
            return c
    return choices[-1]


# ----------------------------- Pallas kernels ------------------------------

def _matmul_stats_kernel(x_ref, w_ref, y_ref, stats_ref, acc_ref):
    """Tiled matmul with f32 accumulator.  On the last K step also emit the
    per-M-tile column sum / sum-of-squares used for train-mode BatchNorm."""
    k = pl.program_id(2)

    @pl.when(k == 0)
    def _():
        acc_ref[...] = jnp.zeros_like(acc_ref)

    acc_ref[...] += jnp.dot(x_ref[...], w_ref[...],
                            preferred_element_type=jnp.float32)

    @pl.when(k == pl.num_programs(2) - 1)
    def _():
        acc = acc_ref[...]
        y_ref[...] = acc
        s = jnp.sum(acc, axis=0, keepdims=True)
        sq = jnp.sum(acc * acc, axis=0, keepdims=True)
        stats_ref[0] = jnp.concatenate([s, sq], axis=0)      # (2, tn)


def _affine_kernel(*refs, relu, add_res, m_true, tm):
    """y*scale + shift (+ residual) (+ ReLU), padded rows masked back to zero."""
    if add_res:
        y_ref, scale_ref, shift_ref, res_ref, o_ref = refs
    else:
        y_ref, scale_ref, shift_ref, o_ref = refs
        res_ref = None
    y = y_ref[...] * scale_ref[...] + shift_ref[...]
    if add_res:
        y = y + res_ref[...].astype(jnp.float32)
    if relu:
        y = jnp.maximum(y, 0.0)
    if m_true is not None:
        rows = pl.program_id(0) * tm + jax.lax.broadcasted_iota(jnp.int32, y.shape, 0)
        y = jnp.where(rows < m_true, y, 0.0)
    o_ref[...] = y.astype(o_ref.dtype)


def _mean_axis1_kernel(p_ref, o_ref):
    o_ref[...] = jnp.mean(p_ref[...].astype(jnp.float32), axis=1)


def _contrastive_kernel(emb_ref, pmask_ref, nmask_ref, o_ref, *, batch_size):
    x = emb_ref[...]                                               # (2B, D)
    norm = jnp.sqrt(jnp.sum(x * x, axis=1, keepdims=True))
    z = x / jnp.maximum(norm, NORM_EPS)                            # F.normalize(dim=1)
    sim = jax.lax.dot_general(z, z, (((1,), (1,)), ((), ())),      # z @ z.T  (cosine sim)
                              preferred_element_type=jnp.float32)
    pos = jnp.sum(sim * pmask_ref[...], axis=1, keepdims=True)     # diag(+B) ++ diag(-B)
    nom = jnp.exp(pos / TEMPERATURE)
    den = jnp.sum(nmask_ref[...] * jnp.exp(sim / TEMPERATURE), axis=1, keepdims=True)
    lp = -jnp.log(nom / den)
    o_ref[...] = jnp.sum(lp, axis=0, keepdims=True) / (2.0 * batch_size)


# --------------------------- pallas_call builders ---------------------------

@functools.lru_cache(maxsize=None)
def _build_matmul(mp, kp, np_, tm, tk, tn):
    grid = (mp // tm, np_ // tn, kp // tk)
    fn = pl.pallas_call(
        _matmul_stats_kernel,
        out_shape=(jax.ShapeDtypeStruct((mp, np_), jnp.float32),
                   jax.ShapeDtypeStruct((grid[0], 2, np_), jnp.float32)),
        grid_spec=pltpu.PrefetchScalarGridSpec(
            num_scalar_prefetch=0,
            grid=grid,
            in_specs=[pl.BlockSpec((tm, tk), lambda i, j, k: (i, k)),
                      pl.BlockSpec((tk, tn), lambda i, j, k: (k, j))],
            out_specs=[pl.BlockSpec((tm, tn), lambda i, j, k: (i, j)),
                       pl.BlockSpec((1, 2, tn), lambda i, j, k: (i, 0, j))],
            scratch_shapes=[pltpu.VMEM((tm, tn), jnp.float32)]),
        compiler_params=pltpu.CompilerParams(
            dimension_semantics=("parallel", "parallel", "arbitrary"),
            vmem_limit_bytes=_VMEM_LIMIT),
    )
    return jax.jit(fn)


def matmul_tiled(x2d, w_pad):
    """x2d: (M, K); w_pad: (Kp, Np) bf16 with Kp, Np multiples of 128 and Kp >= K.
    Returns (y (Mp, Np) f32, stats (Mp//tm, 2, Np) f32, (Mp, Np, tm, tn))."""
    m, k = x2d.shape
    kp, np_ = w_pad.shape
    mp = _round_up(m, 16)
    xb = x2d.astype(jnp.bfloat16)
    if (mp, kp) != (m, k):
        xb = jnp.pad(xb, ((0, mp - m), (0, kp - k)))
    tm = _pick_tile(mp, (256, 128, 64, 32, 16))
    tk = _pick_tile(kp, (512, 256, 128))
    tn = _pick_tile(np_, (512, 256, 128))
    y, stats = _build_matmul(mp, kp, np_, tm, tk, tn)(xb, w_pad)
    return y, stats, (mp, np_, tm, tn)


@functools.lru_cache(maxsize=None)
def _build_affine(mp, np_, tm, tn, relu, add_res, m_true):
    kernel = functools.partial(_affine_kernel, relu=relu, add_res=add_res,
                               m_true=m_true, tm=tm)
    in_specs = [pl.BlockSpec((tm, tn), lambda i, j: (i, j)),
                pl.BlockSpec((1, tn), lambda i, j: (0, j)),
                pl.BlockSpec((1, tn), lambda i, j: (0, j))]
    if add_res:
        in_specs.append(pl.BlockSpec((tm, tn), lambda i, j: (i, j)))
    fn = pl.pallas_call(
        kernel,
        out_shape=jax.ShapeDtypeStruct((mp, np_), jnp.bfloat16),
        grid_spec=pltpu.PrefetchScalarGridSpec(
            num_scalar_prefetch=0,
            grid=(mp // tm, np_ // tn),
            in_specs=in_specs,
            out_specs=pl.BlockSpec((tm, tn), lambda i, j: (i, j))),
        compiler_params=pltpu.CompilerParams(
            dimension_semantics=("parallel", "parallel"),
            vmem_limit_bytes=_VMEM_LIMIT),
    )
    return jax.jit(fn)


def _bn_scale_shift(stats, count, gamma, beta):
    s = jnp.sum(stats, axis=0)                               # (2, Np)
    mean = s[0] / count
    var = jnp.maximum(s[1] / count - mean * mean, 0.0)       # biased var (PyTorch train BN)
    scale = gamma * jax.lax.rsqrt(var + BN_EPS)
    shift = beta - mean * scale
    return scale.reshape(1, -1), shift.reshape(1, -1)


def affine_apply(y, scale, shift, res, *, relu, m_true, mp, np_, tm, tn):
    mask_m = m_true if mp > m_true else None
    add_res = res is not None
    fn = _build_affine(mp, np_, tm, tn, bool(relu), add_res, mask_m)
    args = (y, scale.astype(jnp.float32), shift.astype(jnp.float32))
    if add_res:
        args = args + (res,)
    return fn(*args)


@functools.lru_cache(maxsize=None)
def _build_mean(n, r, c):
    fn = pl.pallas_call(
        _mean_axis1_kernel,
        out_shape=jax.ShapeDtypeStruct((n, c), jnp.float32),
        in_specs=[pl.BlockSpec(memory_space=pltpu.MemorySpace.VMEM)],
        out_specs=pl.BlockSpec(memory_space=pltpu.MemorySpace.VMEM),
        compiler_params=pltpu.CompilerParams(vmem_limit_bytes=_VMEM_LIMIT),
    )
    return jax.jit(fn)


@functools.lru_cache(maxsize=None)
def _build_contrastive(b, d):
    kernel = functools.partial(_contrastive_kernel, batch_size=b)
    fn = pl.pallas_call(
        kernel,
        out_shape=jax.ShapeDtypeStruct((1, 1), jnp.float32),
        in_specs=[pl.BlockSpec(memory_space=pltpu.MemorySpace.VMEM)] * 3,
        out_specs=pl.BlockSpec(memory_space=pltpu.MemorySpace.VMEM),
        compiler_params=pltpu.CompilerParams(vmem_limit_bytes=_VMEM_LIMIT),
    )
    return jax.jit(fn)


def contrastive_loss(emb_i, emb_j, batch_size):
    emb = jnp.concatenate([emb_i, emb_j], axis=0).astype(jnp.float32)   # (2B, D)
    two_b = 2 * batch_size
    neg_mask = 1.0 - jnp.eye(two_b, dtype=jnp.float32)                  # negatives_mask
    pos_cols = (jnp.arange(two_b) + batch_size) % two_b                 # diag(+B) ++ diag(-B)
    pos_mask = jax.nn.one_hot(pos_cols, two_b, dtype=jnp.float32)
    loss = _build_contrastive(batch_size, emb.shape[1])(emb, pos_mask, neg_mask)
    return loss[0, 0]


# ------------------------ activation layout / conv glue ----------------------

def _to_act(x_nhwc):
    """Pack an NHWC activation into the padded 2-D bf16 inter-layer layout."""
    n, h, w, c = x_nhwc.shape
    m = n * h * w
    mp, cp = _round_up(m, 16), _round_up(c, 128)
    d = x_nhwc.reshape(m, c).astype(jnp.bfloat16)
    d = jnp.pad(d, ((0, mp - m), (0, cp - c)))
    return {"data": d, "shape": (n, h, w, c)}


def _view(act):
    n, h, w, c = act["shape"]
    return act["data"][:n * h * w, :c].reshape(n, h, w, c)


def _im2col(x, ksize, stride, padding):
    n, h, w, c = x.shape
    if padding > 0:
        x = jnp.pad(x, ((0, 0), (padding, padding), (padding, padding), (0, 0)))
    hp, wp = x.shape[1], x.shape[2]
    ho = (hp - ksize) // stride + 1
    wo = (wp - ksize) // stride + 1
    cols = []
    for kh in range(ksize):
        for kw in range(ksize):
            cols.append(x[:, kh:kh + stride * ho:stride, kw:kw + stride * wo:stride, :])
    patches = jnp.concatenate(cols, axis=-1)               # (N, Ho, Wo, K*K*C)
    return patches.reshape(n * ho * wo, ksize * ksize * c), (ho, wo)


def conv_bn_act(x, p, stride, padding, *, relu, residual=None):
    """Conv2d(bias=False) + train-mode BatchNorm2d + optional residual + optional ReLU.

    `x` is either the padded 2-D activation dict or a raw NHWC f32 array (stem)."""
    if isinstance(x, dict):
        n, h, w, c = x["shape"]
    else:
        n, h, w, c = x.shape
    ks = p["ksize"]

    if isinstance(x, dict) and ks == 1 and padding == 0:
        if stride == 1:
            x2d = x["data"]                              # consume padded slab directly
            ho, wo = h, w
        else:
            cp = x["data"].shape[1]
            v = x["data"][:n * h * w].reshape(n, h, w, cp)[:, ::stride, ::stride, :]
            ho, wo = v.shape[1], v.shape[2]
            x2d = v.reshape(n * ho * wo, cp)
    else:
        # TODO(synk): 3x3 / 7x7 convs still materialize bf16 im2col patches in HBM; a
        # direct windowed-accumulation Pallas conv kernel would cut this traffic further.
        v = _view(x) if isinstance(x, dict) else x
        x2d, (ho, wo) = _im2col(v, ks, stride, padding)

    m_true = n * ho * wo
    y, stats, (mp, np_, tm, tn) = matmul_tiled(x2d, p["w"])
    scale, shift = _bn_scale_shift(stats, m_true, p["gamma"], p["beta"])
    res_data = residual["data"] if residual is not None else None
    out = affine_apply(y, scale, shift, res_data, relu=relu, m_true=m_true,
                       mp=mp, np_=np_, tm=tm, tn=tn)
    return {"data": out, "shape": (n, ho, wo, p["cout"])}


def max_pool_3x3_s2_p1(act):
    # Elementwise max tree over shifted views (no 9x patch materialization).
    x = _view(act)
    n, h, w, c = x.shape
    xp = jnp.pad(x, ((0, 0), (1, 1), (1, 1), (0, 0)), constant_values=-jnp.inf)
    ho = (h + 2 - 3) // 2 + 1
    wo = (w + 2 - 3) // 2 + 1
    out = None
    for kh in range(3):
        for kw in range(3):
            v = xp[:, kh:kh + 2 * ho:2, kw:kw + 2 * wo:2, :]
            out = v if out is None else jnp.maximum(out, v)
    return _to_act(out)


def global_avg_pool(act):
    n, h, w, c = act["shape"]
    x = _view(act).reshape(n, h * w, c)
    return _build_mean(n, h * w, c)(x)                    # (N, C) f32


# ------------------------------ parameter init ------------------------------

class _Keys:
    def __init__(self, seed):
        self._key = jax.random.PRNGKey(seed)

    def next(self):
        self._key, k = jax.random.split(self._key)
        return k


def _pad_weight(w, kp, np_):
    k, n = w.shape
    wp = jnp.zeros((kp, np_), jnp.float32).at[:k, :n].set(w)
    return wp.astype(jnp.bfloat16)


def _init_conv(key, ksize, cin, cout):
    fan_in = ksize * ksize * cin
    w = jax.random.normal(key, (fan_in, cout), jnp.float32) * (2.0 / fan_in) ** 0.5
    # 1x1 convs consume the channel-padded 2-D activation layout directly.
    kp = _round_up(cin, 128) if ksize == 1 else _round_up(fan_in, 128)
    np_ = _round_up(cout, 128)
    gamma = jnp.zeros((np_,), jnp.float32).at[:cout].set(1.0)
    beta = jnp.zeros((np_,), jnp.float32)
    return {"w": _pad_weight(w, kp, np_), "gamma": gamma, "beta": beta,
            "ksize": ksize, "cout": cout}


def _init_bottleneck(kg, cin, outs, with_down):
    p = {"c1": _init_conv(kg.next(), 1, cin, outs[0]),
         "c2": _init_conv(kg.next(), 3, outs[0], outs[1]),
         "c3": _init_conv(kg.next(), 1, outs[1], outs[2])}
    if with_down:
        p["down"] = _init_conv(kg.next(), 1, cin, outs[2])
    return p


def _init_resnet50(kg, start_channels):
    params = {"stem": _init_conv(kg.next(), 7, start_channels, 64)}
    cfg = [("stage1", 64,   [64, 64, 256],    3, (1, 1, 1, 1)),
           ("stage2", 256,  [128, 128, 512],  4, (1, 2, 1, 2)),
           ("stage3", 512,  [256, 256, 1024], 6, (1, 2, 1, 2)),
           ("stage4", 1024, [512, 512, 2048], 3, (1, 2, 1, 2))]
    for name, cin, outs, n, strides in cfg:
        blocks = [{"p": _init_bottleneck(kg, cin, outs, True), "strides": strides}]
        for _ in range(n - 1):
            blocks.append({"p": _init_bottleneck(kg, outs[2], outs, False), "strides": None})
        params[name] = blocks
    return params


def init_fusion_params(seed=1):
    kg = _Keys(seed)
    # NOTE: Linear biases that feed straight into a train-mode BatchNorm are mathematically
    # cancelled by the mean subtraction, so they are omitted (dead-bias removal).
    return {
        "ori": _init_resnet50(kg, 3),
        "grad": _init_resnet50(kg, 8),
        "gender": {
            "w": _pad_weight(jax.random.normal(kg.next(), (1, 32), jnp.float32), 128, 128),
            "gamma": jnp.zeros((128,), jnp.float32).at[:32].set(1.0),
            "beta": jnp.zeros((128,), jnp.float32),
        },
        # TODO(synk): PyTorch __init__ declares nn.Linear(2048 + 32, 1024) but the forward
        # concatenates (ori_fea, grad_fea, gender_encode) = 2048+2048+32 features; we size
        # the first MLP linear to 4128 to match the forward's concatenation.
        "mlp": {
            "w1": _pad_weight(
                jax.random.normal(kg.next(), (4128, 1024), jnp.float32) * (1.0 / 4128 ** 0.5),
                4224, 1024),
            "g1": jnp.ones((1024,), jnp.float32),
            "beta1": jnp.zeros((1024,), jnp.float32),
            "w2": _pad_weight(
                jax.random.normal(kg.next(), (1024, 1), jnp.float32) * (1.0 / 1024 ** 0.5),
                1024, 128),
            "b2": jnp.zeros((1,), jnp.float32),
        },
    }


# --------------------------------- forward ----------------------------------

def _bottleneck_forward(x, blk):
    p, strides = blk["p"], blk["strides"]
    if strides is not None:  # ResNet50DownBlock
        s0, s1, s2, s3 = strides
        shortcut = conv_bn_act(x, p["down"], s3, 0, relu=False)
        out = conv_bn_act(x, p["c1"], s0, 0, relu=True)
        out = conv_bn_act(out, p["c2"], s1, 1, relu=True)
        out = conv_bn_act(out, p["c3"], s2, 0, relu=True, residual=shortcut)
    else:                    # ResNet50BasicBlock
        out = conv_bn_act(x, p["c1"], 1, 0, relu=True)
        out = conv_bn_act(out, p["c2"], 1, 1, relu=True)
        out = conv_bn_act(out, p["c3"], 1, 0, relu=True, residual=x)
    return out


def resnet50_forward(x_nhwc, params):
    out = conv_bn_act(x_nhwc, params["stem"], 2, 3, relu=True)
    out = max_pool_3x3_s2_p1(out)
    for name in ("stage1", "stage2", "stage3", "stage4"):
        for blk in params[name]:
            out = _bottleneck_forward(out, blk)
    return global_avg_pool(out)                            # (N, 2048) pooled feature


def fusion_forward(params, ori, grad, gender, batch_size):
    # PyTorch inputs are NCHW -> convert to NHWC for the kernels.
    ori_nhwc = jnp.transpose(ori, (0, 2, 3, 1)).astype(jnp.float32)
    grad_nhwc = jnp.transpose(grad, (0, 2, 3, 1)).astype(jnp.float32)

    # TODO(synk): ResNet50.forward returns a 5-tuple; the PyTorch fusion.forward feeds the
    # whole tuple into ContrastiveLoss / cat (which would error) — we use the pooled 2048-d
    # feature `fea` for both, which is the only consistent interpretation.
    ori_fea = resnet50_forward(ori_nhwc, params["ori"])
    grad_fea = resnet50_forward(grad_nhwc, params["grad"])

    loss = contrastive_loss(ori_fea, grad_fea, batch_size)

    # gender encoder: Linear(1, 32) + BatchNorm1d + ReLU (K padded to 128, lane-dense N=128)
    gp = params["gender"]
    gy, gstats, (gmp, gnp, gtm, gtn) = matmul_tiled(gender.astype(jnp.float32), gp["w"])
    gscale, gshift = _bn_scale_shift(gstats, batch_size, gp["gamma"], gp["beta"])
    genc = affine_apply(gy, gscale, gshift, None, relu=True, m_true=batch_size,
                        mp=gmp, np_=gnp, tm=gtm, tn=gtn)[:batch_size, :32]

    # MLP head: Linear(4128,1024)+BN1d+ReLU, then Linear(1024,1) (output padded to 128 lanes)
    feat = jnp.concatenate([ori_fea, grad_fea, genc.astype(jnp.float32)], axis=-1)  # (N, 4128)
    mp = params["mlp"]
    hy, hstats, (hmp, hnp, htm, htn) = matmul_tiled(feat, mp["w1"])
    hscale, hshift = _bn_scale_shift(hstats, batch_size, mp["g1"], mp["beta1"])
    h = affine_apply(hy, hscale, hshift, None, relu=True, m_true=batch_size,
                     mp=hmp, np_=hnp, tm=htm, tn=htn)
    py, _, _ = matmul_tiled(h, mp["w2"])
    pred = py[:batch_size, :1] + mp["b2"]                                           # (N, 1)
    return loss, pred


# ----------------------------------- main ------------------------------------

if __name__ == "__main__":
    batch_size = 2
    H = W = 16

    key = jax.random.PRNGKey(0)
    k1, k2, k3 = jax.random.split(key, 3)
    ori = jax.random.normal(k1, (batch_size, 3, H, W), jnp.float32)    # NCHW, like PyTorch
    grad = jax.random.normal(k2, (batch_size, 8, H, W), jnp.float32)   # NCHW
    gender = jax.random.normal(k3, (batch_size, 1), jnp.float32)

    params = init_fusion_params(seed=1)

    loss, pred = fusion_forward(params, ori, grad, gender, batch_size)
    jax.block_until_ready((loss, pred))
    print("KERNEL_OK")
</pallas_src>

<mosaic_0001>
module attributes {stable_mosaic.version = 11 : i64} {
  func.func @_matmul_stats_kernel(%arg0: i32, %arg1: i32, %arg2: i32, %arg3: memref<128x256xbf16, #tpu.memory_space<vmem>>, %arg4: memref<256x128xbf16, #tpu.memory_space<vmem>>, %arg5: memref<128x128xf32, #tpu.memory_space<vmem>>, %arg6: memref<1x2x128xf32, #tpu.memory_space<vmem>>, %arg7: memref<128x128xf32, #tpu.memory_space<vmem>>) attributes {dimension_semantics = [#tpu.dimension_semantics<parallel>, #tpu.dimension_semantics<parallel>, #tpu.dimension_semantics<arbitrary>], iteration_bounds = array<i64: 1, 1, 1>, scalar_prefetch = 0 : i64, scratch_operands = 1 : i64, tpu.core_type = #tpu.core_type<tc>, window_params = [{transform_indices = @transform_0, window_bounds = array<i64: 128, 256>}, {transform_indices = @transform_1, window_bounds = array<i64: 256, 128>}, {transform_indices = @transform_2, window_bounds = array<i64: 128, 128>}, {transform_indices = @transform_3, window_bounds = array<i64: 1, 2, 128>}]} {
    %c0_i32 = arith.constant 0 : i32
    %0 = arith.cmpi eq, %arg2, %c0_i32 : i32
    %1 = arith.extui %0 : i1 to i32
    %c0_i32_0 = arith.constant 0 : i32
    %2 = arith.cmpi ne, %1, %c0_i32_0 : i32
    scf.if %2 {
      %cst_10 = arith.constant 0.000000e+00 : f32
      %12 = vector.broadcast %cst_10 : f32 to vector<128x128xf32>
      %c0_11 = arith.constant 0 : index
      %c0_12 = arith.constant 0 : index
      %13 = vector.load %arg7[%c0_11, %c0_12] : memref<128x128xf32, #tpu.memory_space<vmem>>, vector<128x128xf32>
      tpu.vector_store %arg7[%c0_11, %c0_12], %12 {strides = array<i32>} : memref<128x128xf32, #tpu.memory_space<vmem>>, vector<128x128xf32>,
    } else {
    }
    %c0 = arith.constant 0 : index
    %c0_1 = arith.constant 0 : index
    %3 = vector.load %arg7[%c0, %c0_1] : memref<128x128xf32, #tpu.memory_space<vmem>>, vector<128x128xf32>
    %c0_2 = arith.constant 0 : index
    %c0_3 = arith.constant 0 : index
    %4 = vector.load %arg3[%c0_2, %c0_3] : memref<128x256xbf16, #tpu.memory_space<vmem>>, vector<128x256xbf16>
    %c0_4 = arith.constant 0 : index
    %c0_5 = arith.constant 0 : index
    %5 = vector.load %arg4[%c0_4, %c0_5] : memref<256x128xbf16, #tpu.memory_space<vmem>>, vector<256x128xbf16>
    %cst = arith.constant dense<0.000000e+00> : vector<128x128xf32>
    %6 = tpu.matmul %4, %5, %cst {dimension_numbers = #tpu.dot_dimension_numbers<[1], [0], [0], [1], [0, 0, 1, 1], [], []>} : vector<128x256xbf16>, vector<256x128xbf16>, vector<128x128xf32> -> vector<128x128xf32>
    %7 = arith.addf %3, %6 : vector<128x128xf32>
    %c0_6 = arith.constant 0 : index
    %c0_7 = arith.constant 0 : index
    %8 = vector.load %arg7[%c0_6, %c0_7] : memref<128x128xf32, #tpu.memory_space<vmem>>, vector<128x128xf32>
    tpu.vector_store %arg7[%c0_6, %c0_7], %7 {strides = array<i32>} : memref<128x128xf32, #tpu.memory_space<vmem>>, vector<128x128xf32>,
    %c0_i32_8 = arith.constant 0 : i32
    %9 = arith.cmpi eq, %arg2, %c0_i32_8 : i32
    %10 = arith.extui %9 : i1 to i32
    %c0_i32_9 = arith.constant 0 : i32
    %11 = arith.cmpi ne, %10, %c0_i32_9 : i32
    scf.if %11 {
      %c0_10 = arith.constant 0 : index
      %c0_11 = arith.constant 0 : index
      %12 = vector.load %arg7[%c0_10, %c0_11] : memref<128x128xf32, #tpu.memory_space<vmem>>, vector<128x128xf32>
      %c0_12 = arith.constant 0 : index
      %c0_13 = arith.constant 0 : index
      %13 = vector.load %arg5[%c0_12, %c0_13] : memref<128x128xf32, #tpu.memory_space<vmem>>, vector<128x128xf32>
      tpu.vector_store %arg5[%c0_12, %c0_13], %12 {strides = array<i32>} : memref<128x128xf32, #tpu.memory_space<vmem>>, vector<128x128xf32>,
      %cst_14 = arith.constant dense<0.000000e+00> : vector<128xf32>
      %14 = vector.multi_reduction <add>, %12, %cst_14 [0] : vector<128x128xf32> to vector<128xf32>
      %15 = vector.shape_cast %14 : vector<128xf32> to vector<1x128xf32>
      %16 = arith.mulf %12, %12 : vector<128x128xf32>
      %cst_15 = arith.constant dense<0.000000e+00> : vector<128xf32>
      %17 = vector.multi_reduction <add>, %16, %cst_15 [0] : vector<128x128xf32> to vector<128xf32>
      %18 = vector.shape_cast %17 : vector<128xf32> to vector<1x128xf32>
      %19 = tpu.concatenate %15, %18 in 0 : vector<1x128xf32>, vector<1x128xf32> -> vector<2x128xf32>
      %c0_16 = arith.constant 0 : index
      %c0_17 = arith.constant 0 : index
      %c0_18 = arith.constant 0 : index
      %20 = vector.load %arg6[%c0_16, %c0_17, %c0_18] : memref<1x2x128xf32, #tpu.memory_space<vmem>>, vector<1x2x128xf32>
      %21 = vector.shape_cast %20 : vector<1x2x128xf32> to vector<2x128xf32>
      %22 = vector.shape_cast %19 : vector<2x128xf32> to vector<1x2x128xf32>
      tpu.vector_store %arg6[%c0_16, %c0_17, %c0_18], %22 {strides = array<i32>} : memref<1x2x128xf32, #tpu.memory_space<vmem>>, vector<1x2x128xf32>,
    } else {
    }
    return
  }
  func.func @transform_0(%arg0: i32, %arg1: i32, %arg2: i32) -> (i32, i32) {
    %c0_i32 = arith.constant 0 : i32
    return %arg0, %arg2 : i32, i32
  }
  func.func @transform_1(%arg0: i32, %arg1: i32, %arg2: i32) -> (i32, i32) {
    %c0_i32 = arith.constant 0 : i32
    return %arg2, %arg1 : i32, i32
  }
  func.func @transform_2(%arg0: i32, %arg1: i32, %arg2: i32) -> (i32, i32) {
    %c0_i32 = arith.constant 0 : i32
    return %arg0, %arg1 : i32, i32
  }
  func.func @transform_3(%arg0: i32, %arg1: i32, %arg2: i32) -> (i32, i32, i32) {
    %c0_i32 = arith.constant 0 : i32
    %c0_i32_0 = arith.constant 0 : i32
    return %arg0, %c0_i32, %arg1 : i32, i32, i32
  }
}

</mosaic_0001>

<bundles_post_ra>
// kernel: tpu_custom_call.1
= control target key start
LH: loop header
LB: loop body
LE: loop exit
PB: predicated region body
PF: predicated region fallthrough
CT: control target
= control target key end

     0   :  { %9 = vsyncpa [#allocation4], 0  ;;  %s885_s0 = inlined_call_operand.hbm [shape: bf16[128,256], index: 0, kind: input, shape index: {}]   ;;  %s886_s1 = inlined_call_operand.hbm [shape: bf16[256,128], index: 1, kind: input, shape index: {}]   ;;  %s887_s2 = inlined_call_operand.hbm [shape: f32[128,128], index: 2, kind: output, shape index: {0}]   ;;  %s888_s3 = inlined_call_operand.hbm [shape: f32[1,2,128], index: 3, kind: output, shape index: {1}]  }
   0x1   :  { %10 = vsyncpa [#allocation7], 0 }
   0x2   :  { %11 = vsyncpa [#allocation5], 0 }
   0x3   :  { %12 = vsyncpa [#allocation10], 0  ;;  %s809_s12 = smov [#allocation3]  }
   0x4   :  { %s18_s13 = sshll.u32 %s809_s12, 4  ;;  %s19_s13 = int_to_ptr.vmem [resolvable:$true] %s18_s13 }
   0x5   :  { %s729_s14 = scalar_lea.vmem %s19_s13, 2048  ;;  %p734_p1 = scmp.lt.s32.totalorder %s19_s13, %s19_s13 }
   0x6   :  { %p730_p0 = scmp.ne.s32.totalorder %s19_s13, %s729_s14  ;;  %p735_p2 = scmp.lt.s32.totalorder %s729_s14, %s729_s14 }
   0x8   :  { %p736_p3 = por %p735_p2, %p734_p1 }
   0xa   :  { %p737_p4 = pnand %p736_p3, %p730_p0 }
   0xc   :  { %740 = shalt.err (!%p737_p4)
}
   0xd   :  { %s810_s15 = smov 128   ;;  %s811_s16 = smov 8  }
   0xe   :  { %24 = dma.hbm_to_vmem [thread:$0]  %s885_s0, 2048, %s19_s13, [#allocation4], %s810_s15, %s810_s15, %s811_s16  }
   0xf   :  { %s812_s19 = smov [#allocation6]  }
  0x10   :  { %s30_s20 = sshll.u32 %s812_s19, 4  ;;  %s31_s20 = int_to_ptr.vmem [resolvable:$true] %s30_s20 }
  0x11   :  { %s749_s21 = scalar_lea.vmem %s31_s20, 2048  ;;  %p754_p6 = scmp.lt.s32.totalorder %s31_s20, %s31_s20 }
  0x12   :  { %p750_p5 = scmp.ne.s32.totalorder %s31_s20, %s749_s21  ;;  %p755_p7 = scmp.lt.s32.totalorder %s749_s21, %s749_s21 }
  0x14   :  { %p756_p8 = por %p755_p7, %p754_p6 }
  0x16   :  { %p757_p9 = pnand %p756_p8, %p750_p5 }
  0x18   :  { %760 = shalt.err (!%p757_p9)
}
  0x19   :  { %s813_s22 = smov 64   ;;  %s814_s23 = smov 4  }
  0x1a   :  { %36 = dma.hbm_to_vmem [thread:$0]  %s886_s1, 2048, %s31_s20, [#allocation7], %s813_s22, %s813_s22, %s814_s23  }
  0x1b   :  { %801 = dma.done.wait [#allocation4], 2048  }
  0x1c   :  { %802 = vsyncadd [#allocation4], 4294965248 }
  0x1d   :  { %803 = dma.done.wait [#allocation7], 2048  }
  0x1e   :  { %804 = vsyncadd [#allocation7], 4294965248  ;;  %v681_v0 = vld [vmem:[#allocation6 + $0x78] sm:$0xff]   ;;  %v683_v2 = vld [vmem:[#allocation6 + $0x70] sm:$0xff]   ;;  %s815_s0 = smov [#allocation8]  }
  0x1f   :  { %v682_v1 = vld [vmem:[#allocation6 + $0x38] sm:$0xff]   ;;  %593 = vmatprep.subr.bf16.mxu0 %v681_v0  ;;  %657 = vmatprep.subr.bf16.mxu1 %v681_v0  ;;  %v684_v3 = vld [vmem:[#allocation6 + $0x30] sm:$0xff]   ;;  %v685_v4 = vld [vmem:[#allocation6 + $0x68] sm:$0xff]   ;;  %s534_s1 = sshll.u32 %s815_s0, 4  ;;  %s535_s1 = int_to_ptr.vmem [resolvable:$true] %s534_s1 }
  0x20   :  { %594 = vmatpush3.bf16.msra.mxu0 %v682_v1  ;;  %665 = vmatpush3.bf16.msra.mxu1 %v682_v1  ;;  %v686_v5 = vld [vmem:[#allocation6 + $0x28] sm:$0xff]   ;;  %v687_v6 = vld [vmem:[#allocation6 + $0x60] sm:$0xff]   ;;  %v689_v8 = vld [vmem:[#allocation6 + $0x58] sm:$0xff]   ;;  %s761_s26 = scalar_lea.vmem %s535_s1, 2048  ;;  %p766_p11 = scmp.lt.s32.totalorder %s535_s1, %s535_s1 }
  0x21   :  { %595 = vmatprep.subr.bf16.mxu0 %v683_v2  ;;  %658 = vmatprep.subr.bf16.mxu1 %v683_v2  ;;  %v688_v7 = vld [vmem:[#allocation6 + $0x20] sm:$0xff]   ;;  %v690_v9 = vld [vmem:[#allocation6 + $0x18] sm:$0xff]   ;;  %v691_v10 = vld [vmem:[#allocation6 + $0x50] sm:$0xff]   ;;  %p762_p10 = scmp.ne.s32.totalorder %s535_s1, %s761_s26  ;;  %p767_p12 = scmp.lt.s32.totalorder %s761_s26, %s761_s26 }
  0x22   :  { %v699_v11 = vld [vmem:[#allocation3 + $0x4] ss:$8 sps:$4 sm:$0xff]   ;;  %v692_v12 = vld [vmem:[#allocation6 + $0x10] sm:$0xff]   ;;  %v697_v18 = vld [vmem:[#allocation3] ss:$8 sps:$4 sm:$0xff]  }
  0x23   :  { %v705_v13 = vld [vmem:[#allocation3 + $0x44] ss:$8 sps:$4 sm:$0xff]   ;;  %336 = vmatprep.mubr.bf16.mxu0 %v699_v11  ;;  %v703_v19 = vld [vmem:[#allocation3 + $0x40] ss:$8 sps:$4 sm:$0xff]   ;;  %v700_v20 = vld [vmem:[#allocation3 + $0x14] ss:$8 sps:$4 sm:$0xff]   ;;  %p768_p13 = por %p767_p12, %p766_p11 }
  0x24   :  { %596 = vmatpush3.bf16.msra.mxu0 %v684_v3  ;;  %666 = vmatpush3.bf16.msra.mxu1 %v684_v3  ;;  %v693_v14 = vld [vmem:[#allocation6 + $0x48] sm:$0xff]   ;;  %v695_v16 = vld [vmem:[#allocation6 + $0x40] sm:$0xff]   ;;  %v709_v21 = vld [vmem:[#allocation3 + $0x54] ss:$8 sps:$4 sm:$0xff]  }
  0x25   :  { %597 = vmatprep.subr.bf16.mxu0 %v685_v4  ;;  %659 = vmatprep.subr.bf16.mxu1 %v685_v4  ;;  %v694_v15 = vld [vmem:[#allocation6 + $0x8] sm:$0xff]   ;;  %v696_v17 = vld [vmem:[#allocation6] sm:$0xff]   ;;  %v702_v22 = vld [vmem:[#allocation3 + $0x10] ss:$8 sps:$4 sm:$0xff]   ;;  %p769_p0 = pnand %p768_p13, %p762_p10 }
  0x26   :  { %368 = vmatprep.mubr.bf16.mxu1 %v705_v13  ;;  %v711_v23 = vld [vmem:[#allocation3 + $0x50] ss:$8 sps:$4 sm:$0xff]   ;;  %v706_v24 = vld [vmem:[#allocation3 + $0x24] ss:$8 sps:$4 sm:$0xff]   ;;  %v708_v26 = vld [vmem:[#allocation3 + $0x20] ss:$8 sps:$4 sm:$0xff]  }
  0x27   :  { %v715_v25 = vld [vmem:[#allocation3 + $0x64] ss:$8 sps:$4 sm:$0xff]   ;;  %v717_v27 = vld [vmem:[#allocation3 + $0x60] ss:$8 sps:$4 sm:$0xff]   ;;  %v712_v28 = vld [vmem:[#allocation3 + $0x34] ss:$8 sps:$4 sm:$0xff]  }
  0x28   :  { %598 = vmatpush3.bf16.msra.mxu0 %v686_v5  ;;  %667 = vmatpush3.bf16.msra.mxu1 %v686_v5  ;;  %v718_v29 = vld [vmem:[#allocation3 + $0x74] ss:$8 sps:$4 sm:$0xff]   ;;  %v714_v30 = vld [vmem:[#allocation3 + $0x30] ss:$8 sps:$4 sm:$0xff]  }
  0x29   :  { %599 = vmatprep.subr.bf16.mxu0 %v687_v6  ;;  %660 = vmatprep.subr.bf16.mxu1 %v687_v6  ;;  %v720_v31 = vld [vmem:[#allocation3 + $0x70] ss:$8 sps:$4 sm:$0xff]  }
  0x2c   :  { %600 = vmatpush3.bf16.msra.mxu0 %v688_v7  ;;  %668 = vmatpush3.bf16.msra.mxu1 %v688_v7 }
  0x2d   :  { %601 = vmatprep.subr.bf16.mxu0 %v689_v8  ;;  %661 = vmatprep.subr.bf16.mxu1 %v689_v8 }
  0x30   :  { %602 = vmatpush3.bf16.msra.mxu0 %v690_v9  ;;  %669 = vmatpush3.bf16.msra.mxu1 %v690_v9 }
  0x31   :  { %603 = vmatprep.subr.bf16.mxu0 %v691_v10  ;;  %662 = vmatprep.subr.bf16.mxu1 %v691_v10 }
  0x34   :  { %604 = vmatpush3.bf16.msra.mxu0 %v692_v12  ;;  %670 = vmatpush3.bf16.msra.mxu1 %v692_v12 }
  0x35   :  { %605 = vmatprep.subr.bf16.mxu0 %v693_v14  ;;  %663 = vmatprep.subr.bf16.mxu1 %v693_v14 }
  0x38   :  { %606 = vmatpush3.bf16.msra.mxu0 %v694_v15  ;;  %671 = vmatpush3.bf16.msra.mxu1 %v694_v15 }
  0x39   :  { %607 = vmatprep.subr.bf16.mxu0 %v695_v16  ;;  %664 = vmatprep.subr.bf16.mxu1 %v695_v16 }
  0x3c   :  { %608 = vmatpush3.bf16.msra.mxu0 %v696_v17  ;;  %672 = vmatpush3.bf16.msra.mxu1 %v696_v17 }
  0x3f   :  { %337 = vmatmul.mubr.bf16.vlgmr.msra.gmra.mxu0 %v697_v18  ;;  %369 = vmatmul.mubr.bf16.vlgmr.msra.gmra.mxu1 %v703_v19 }
  0x40   :  { %344 = vmatprep.mubr.bf16.mxu0 %v700_v20  ;;  %376 = vmatprep.mubr.bf16.mxu1 %v709_v21 }
  0x47   :  { %345 = vmatmul.mubr.bf16.gmra.mxu0 %v702_v22  ;;  %377 = vmatmul.mubr.bf16.gmra.mxu1 %v711_v23 }
  0x48   :  { %352 = vmatprep.mubr.bf16.mxu0 %v706_v24  ;;  %384 = vmatprep.mubr.bf16.mxu1 %v715_v25 }
  0x4f   :  { %353 = vmatmul.mubr.bf16.gmra.mxu0 %v708_v26  ;;  %385 = vmatmul.mubr.bf16.gmra.mxu1 %v717_v27 }
  0x50   :  { %360 = vmatprep.mubr.bf16.mxu0 %v712_v28  ;;  %392 = vmatprep.mubr.bf16.mxu1 %v718_v29 }
  0x57   :  { %361 = vmatmul.mubr.bf16.gmra.mxu0 %v714_v30  ;;  %393 = vmatmul.mubr.bf16.gmra.mxu1 %v720_v31 }
  0xff   :  { %v609_v32 = vpop.f32.mrf.mxu0  ;;  %v633_v33 = vpop.f32.mrf.mxu1 }
 0x101   :  { %v610_v34 = vpop.f32.mrf.mxu0  ;;  %v634_v35 = vpop.f32.mrf.mxu1 }
 0x102   :  { %v611_v36 = vadd.f32 %v610_v34, %v609_v32  ;;  %v846_v37 = vadd.f32 %v634_v35, %v633_v33 }
 0x103   :  { %v612_v38 = vpop.f32.mrf.mxu0  ;;  %v636_v39 = vpop.f32.mrf.mxu1 }
 0x104   :  { %452 = vst [vmem:[#allocation8] sm:$0xff] %v611_v36  ;;  %460 = vst [vmem:[#allocation8 + $0x40] sm:$0xff] %v846_v37  ;;  %v489_v63 = vmul.f32 %v611_v36, %v611_v36 }
 0x105   :  { %v613_v40 = vpop.f32.mrf.mxu0  ;;  %v637_v41 = vpop.f32.mrf.mxu1 }
 0x106   :  { %v614_v42 = vadd.f32 %v613_v40, %v612_v38  ;;  %v849_v43 = vadd.f32 %v637_v41, %v636_v39 }
 0x107   :  { %v615_v44 = vpop.f32.mrf.mxu0  ;;  %v639_v45 = vpop.f32.mrf.mxu1 }
 0x108   :  { %453 = vst [vmem:[#allocation8 + $0x8] sm:$0xff] %v614_v42  ;;  %461 = vst [vmem:[#allocation8 + $0x48] sm:$0xff] %v849_v43  ;;  %v490_v58 = vmul.f32 %v614_v42, %v614_v42  ;;  %v468_v3 = vadd.f32 %v614_v42, %v611_v36 }
 0x109   :  { %v616_v46 = vpop.f32.mrf.mxu0  ;;  %v640_v47 = vpop.f32.mrf.mxu1 }
 0x10a   :  { %v617_v48 = vadd.f32 %v616_v46, %v615_v44  ;;  %v852_v49 = vadd.f32 %v640_v47, %v639_v45  ;;  %v505_v4 = vadd.f32 %v490_v58, %v489_v63 }
 0x10b   :  { %v618_v50 = vpop.f32.mrf.mxu0  ;;  %v642_v51 = vpop.f32.mrf.mxu1 }
 0x10c   :  { %454 = vst [vmem:[#allocation8 + $0x10] sm:$0xff] %v617_v48  ;;  %462 = vst [vmem:[#allocation8 + $0x50] sm:$0xff] %v852_v49  ;;  %v491_v0 = vmul.f32 %v617_v48, %v617_v48  ;;  %v469_v8 = vadd.f32 %v617_v48, %v468_v3 }
 0x10d   :  { %v619_v52 = vpop.f32.mrf.mxu0  ;;  %v643_v53 = vpop.f32.mrf.mxu1 }
 0x10e   :  { %v620_v54 = vadd.f32 %v619_v52, %v618_v50  ;;  %v855_v55 = vadd.f32 %v643_v53, %v642_v51  ;;  %v506_v11 = vadd.f32 %v505_v4, %v491_v0 }
 0x10f   :  { %v621_v56 = vpop.f32.mrf.mxu0  ;;  %v645_v57 = vpop.f32.mrf.mxu1 }
 0x110   :  { %455 = vst [vmem:[#allocation8 + $0x18] sm:$0xff] %v620_v54  ;;  %463 = vst [vmem:[#allocation8 + $0x58] sm:$0xff] %v855_v55  ;;  %v492_v5 = vmul.f32 %v620_v54, %v620_v54  ;;  %v470_v14 = vadd.f32 %v620_v54, %v469_v8 }
 0x111   :  { %v622_v59 = vpop.f32.mrf.mxu0  ;;  %v646_v60 = vpop.f32.mrf.mxu1 }
 0x112   :  { %v623_v61 = vadd.f32 %v622_v59, %v621_v56  ;;  %v858_v62 = vadd.f32 %v646_v60, %v645_v57  ;;  %v507_v16 = vadd.f32 %v506_v11, %v492_v5 }
 0x113   :  { %v624_v1 = vpop.f32.mrf.mxu0  ;;  %v648_v2 = vpop.f32.mrf.mxu1 }
 0x114   :  { %456 = vst [vmem:[#allocation8 + $0x20] sm:$0xff] %v623_v61  ;;  %464 = vst [vmem:[#allocation8 + $0x60] sm:$0xff] %v858_v62  ;;  %v493_v15 = vmul.f32 %v623_v61, %v623_v61  ;;  %v471_v19 = vadd.f32 %v623_v61, %v470_v14 }
 0x115   :  { %v625_v6 = vpop.f32.mrf.mxu0  ;;  %v649_v7 = vpop.f32.mrf.mxu1 }
 0x116   :  { %v626_v9 = vadd.f32 %v625_v6, %v624_v1  ;;  %v650_v10 = vadd.f32 %v649_v7, %v648_v2  ;;  %v508_v25 = vadd.f32 %v507_v16, %v493_v15 }
 0x117   :  { %v627_v12 = vpop.f32.mrf.mxu0  ;;  %v651_v13 = vpop.f32.mrf.mxu1 }
 0x118   :  { %457 = vst [vmem:[#allocation8 + $0x28] sm:$0xff] %v626_v9  ;;  %465 = vst [vmem:[#allocation8 + $0x68] sm:$0xff] %v650_v10  ;;  %v494_v20 = vmul.f32 %v626_v9, %v626_v9  ;;  %v472_v26 = vadd.f32 %v626_v9, %v471_v19 }
 0x119   :  { %v628_v17 = vpop.f32.mrf.mxu0  ;;  %v652_v18 = vpop.f32.mrf.mxu1 }
 0x11a   :  { %v629_v21 = vadd.f32 %v628_v17, %v627_v12  ;;  %v653_v22 = vadd.f32 %v652_v18, %v651_v13  ;;  %v509_v30 = vadd.f32 %v508_v25, %v494_v20 }
 0x11b   :  { %v630_v23 = vpop.f32.mrf.mxu0  ;;  %v654_v24 = vpop.f32.mrf.mxu1 }
 0x11c   :  { %458 = vst [vmem:[#allocation8 + $0x30] sm:$0xff] %v629_v21  ;;  %v495_v27 = vmul.f32 %v629_v21, %v629_v21  ;;  %466 = vst [vmem:[#allocation8 + $0x70] sm:$0xff] %v653_v22  ;;  %v473_v31 = vadd.f32 %v629_v21, %v472_v26 }
 0x11d   :  { %v631_v28 = vpop.f32.mrf.mxu0  ;;  %v655_v29 = vpop.f32.mrf.mxu1 }
 0x11e   :  { %v632_v32 = vadd.f32 %v631_v28, %v630_v23  ;;  %v656_v33 = vadd.f32 %v655_v29, %v654_v24  ;;  %v510_v34 = vadd.f32 %v509_v30, %v495_v27 }
 0x120   :  { %459 = vst [vmem:[#allocation8 + $0x38] sm:$0xff] %v632_v32  ;;  %v474_v35 = vadd.f32 %v632_v32, %v473_v31  ;;  %v496_v36 = vmul.f32 %v632_v32, %v632_v32  ;;  %467 = vst [vmem:[#allocation8 + $0x78] sm:$0xff] %v656_v33 }
 0x121   :  { %772 = shalt.err (!%p769_p0)
}
 0x122   :  { %540 = dma.vmem_to_hbm [thread:$0]  %s535_s1, 2048, %s887_s2, [#allocation5], %s810_s15, %s810_s15, %s811_s16   ;;  %v497_v38 = vmul.f32 %v846_v37, %v846_v37  ;;  %v475_v39 = vadd.f32 %v846_v37, %v474_v35  ;;  %v511_v40 = vadd.f32 %v510_v34, %v496_v36  ;;  %v498_v41 = vmul.f32 %v849_v43, %v849_v43 }
 0x123   :  { %v499_v45 = vmul.f32 %v852_v49, %v852_v49  ;;  %v500_v48 = vmul.f32 %v855_v55, %v855_v55  ;;  %v501_v37 = vmul.f32 %v858_v62, %v858_v62  ;;  %v502_v54 = vmul.f32 %v650_v10, %v650_v10  ;;  %s816_s2 = smov [#allocation9]  }
 0x124   :  { %v476_v42 = vadd.f32 %v849_v43, %v475_v39  ;;  %v512_v44 = vadd.f32 %v511_v40, %v497_v38  ;;  %v503_v59 = vmul.f32 %v653_v22, %v653_v22  ;;  %v504_v61 = vmul.f32 %v656_v33, %v656_v33  ;;  %s547_s29 = sshll.u32 %s816_s2, 4  ;;  %s548_s29 = int_to_ptr.vmem [resolvable:$true] %s547_s29 }
 0x125   :  { %vm526_vm0 = vcmask 1040384   ;;  %s781_s30 = scalar_lea.vmem %s548_s29, 32  ;;  %p786_p2 = scmp.lt.s32.totalorder %s548_s29, %s548_s29 }
 0x126   :  { %v513_v46 = vadd.f32 %v512_v44, %v498_v41  ;;  %v477_v47 = vadd.f32 %v852_v49, %v476_v42  ;;  %p782_p1 = scmp.ne.s32.totalorder %s548_s29, %s781_s30  ;;  %p787_p3 = scmp.lt.s32.totalorder %s781_s30, %s781_s30 }
 0x128   :  { %v478_v50 = vadd.f32 %v855_v55, %v477_v47  ;;  %v514_v51 = vadd.f32 %v513_v46, %v499_v45  ;;  %p788_p4 = por %p787_p3, %p786_p2 }
 0x12a   :  { %v479_v52 = vadd.f32 %v858_v62, %v478_v50  ;;  %v515_v53 = vadd.f32 %v514_v51, %v500_v48  ;;  %p789_p5 = pnand %p788_p4, %p782_p1 }
 0x12c   :  { %v480_v43 = vadd.f32 %v650_v10, %v479_v52  ;;  %v516_v56 = vadd.f32 %v515_v53, %v501_v37 }
 0x12e   :  { %v517_v57 = vadd.f32 %v516_v56, %v502_v54  ;;  %v481_v58 = vadd.f32 %v653_v22, %v480_v43 }
 0x130   :  { %v518_v60 = vadd.f32 %v517_v57, %v503_v59  ;;  %v482_v49 = vadd.f32 %v656_v33, %v481_v58 }
 0x132   :  { %v483_v63 = vrot.slane %v482_v49, 4  ;;  %v519_v0 = vadd.f32 %v518_v60, %v504_v61 }
 0x134   :  { %v484_v1 = vadd.f32 %v483_v63, %v482_v49  ;;  %v520_v55 = vrot.slane %v519_v0, 4 }
 0x136   :  { %v485_v2 = vrot.slane %v484_v1, 2  ;;  %v521_v3 = vadd.f32 %v520_v55, %v519_v0 }
 0x138   :  { %v486_v4 = vadd.f32 %v485_v2, %v484_v1  ;;  %v522_v5 = vrot.slane %v521_v3, 2 }
 0x13a   :  { %v487_v6 = vrot.slane %v486_v4, 1  ;;  %v523_v62 = vadd.f32 %v522_v5, %v521_v3 }
 0x13c   :  { %v524_v7 = vrot.slane %v523_v62, 1  ;;  %v488_v8 = vadd.f32 %v487_v6, %v486_v4 }
 0x13e   :  { %v525_v9 = vadd.f32 %v524_v7, %v523_v62 }
 0x140   :  { %v527_v10 = vsel %vm526_vm0, %v488_v8, %v525_v9 }
 0x141   :  { %528 = vst [vmem:[#allocation9] sm:$0x3] %v527_v10 }
 0x142   :  { %792 = shalt.err (!%p789_p5)
}
 0x143   :  { %550 = dma.vmem_to_hbm [thread:$0]  %s548_s29, 32, %s888_s3, [#allocation10]  }
 0x144   :  { %805 = dma.done.wait [#allocation5], 2048  }
 0x145   :  { %806 = vsyncadd [#allocation5], 4294965248 }
 0x146   :  { %807 = dma.done.wait [#allocation10], 32  }
 0x147   :  { %808 = vsyncadd [#allocation10], 4294967264 }
 0x148   :  { %557 = vsyncpa [#allocation4], 1 }
 0x149   :  { %558 = vsyncpa [#allocation7], 1 }
 0x14a   :  { %559 = vsyncpa [#allocation5], 1 }
 0x14b   :  { %560 = vsyncpa [#allocation10], 1 }

</bundles_post_ra>
